<compile_context>
chip_gen: v6e
topology: v6e:2x2x1
jax: 0.10.0
libtpu: 0.0.40
codegen_flags: <defaults>
</compile_context>

<pallas_src>
import functools

import numpy as np
import jax
import jax.numpy as jnp
from jax.experimental import pallas as pl
from jax.experimental.pallas import tpu as pltpu

EPS = 1e-8
N_PAD = 128            # padded output width of the final linear (lane-dense)
TP_TARGET = 8192       # target spectrum-tile length along the P reduction axis
BATCH_TILE_MIN = 16    # bf16-friendly sublane granularity for the batch tile


def _round_up(x, m):
    return ((x + m - 1) // m) * m


def _cdiv(a, b):
    return -(-a // b)


def _vmem_estimate(tb, tp, vlp):
    """Rough per-step VMEM bytes (pipelined operands counted x2)."""
    spec = 2 * tb * tp * 2          # bf16 spectrum tile (double-buffered)
    mask = 2 * tp * vlp * 2         # bf16 one-hot radial-bin tile
    cnt = 2 * 8 * vlp * 4           # 1/count row (sublane-padded)
    wbuf = 2 * vlp * N_PAD * 4      # padded linear weight
    out = 2 * tb * N_PAD * 4        # output tile
    acc = tb * vlp * 4              # f32 accumulator scratch (single buffer)
    return spec + mask + cnt + wbuf + out + acc


def _radial_bins(rows, cols):
    """One-hot radial-bin matrix (P, VL) + per-bin counts, SpectralLoss layout."""
    shift_rows = rows // 2
    cols_onesided = cols // 2 + 1
    r = np.indices((rows, cols_onesided)) - np.array([[[shift_rows]], [[0]]])
    r = np.sqrt(r[0] ** 2 + r[1] ** 2).astype(np.int32)
    r = np.fft.ifftshift(r, axes=0)          # rows only, matching rfft2 layout
    vl = int(r.max()) + 1
    r_flat = r.reshape(-1)
    p = r_flat.shape[0]
    onehot = np.zeros((p, vl), dtype=np.float32)
    onehot[np.arange(p), r_flat] = 1.0
    counts = np.maximum(onehot.sum(axis=0), 1.0)   # guard empty bins (no NaN)
    return onehot, counts, vl


def _spectral_kernel(spec_ref, mask_ref, inv_cnt_ref, w_ref, out_ref, acc_ref,
                     *, vl):
    k = pl.program_id(1)

    @pl.when(k == 0)
    def _():
        acc_ref[...] = jnp.zeros_like(acc_ref)

    # Radial (azimuthal) binning: bf16 MXU matmul, f32 accumulation over the
    # P-tiled reduction axis.  The one-hot mask is exact in bf16; the per-bin
    # 1/count scale is applied in f32 in the epilogue.
    acc_ref[...] += jnp.dot(spec_ref[...], mask_ref[...],
                            preferred_element_type=jnp.float32)

    @pl.when(k == pl.num_programs(1) - 1)
    def _():
        profile = acc_ref[...] * inv_cnt_ref[...]             # (TB, VLp) f32
        # Per-sample min/max normalization over the valid radius bins only
        # (padded bins excluded from the reductions, then zeroed).
        valid = jax.lax.broadcasted_iota(jnp.int32, profile.shape, 1) < vl
        pmin = jnp.min(jnp.where(valid, profile, jnp.float32(1e30)),
                       axis=1, keepdims=True)
        pmax = jnp.max(jnp.where(valid, profile, jnp.float32(-1e30)),
                       axis=1, keepdims=True)
        prof = jnp.where(valid, (profile - pmin) / (pmax - pmin + EPS), 0.0)
        # LinearSpectral (bias added in the wrapper): (TB, VLp) @ (VLp, N_PAD);
        # only column 0 of the padded weight is non-zero.
        out_ref[...] = jnp.dot(prof, w_ref[...],
                               preferred_element_type=jnp.float32)


def _choose_tiles(batch, p, vlp, budget):
    nk = max(1, _cdiv(p, TP_TARGET))
    tp = _round_up(_cdiv(p, nk), 128)
    tb = min(128, _round_up(batch, BATCH_TILE_MIN))
    if batch > BATCH_TILE_MIN:
        # >=2 batch tiles so the "parallel" axis shards across v7x's 2 TCs.
        tb = min(tb, _round_up(_cdiv(batch, 2), BATCH_TILE_MIN))
    while tb > BATCH_TILE_MIN and _vmem_estimate(tb, tp, vlp) > budget:
        tb = max(BATCH_TILE_MIN, _round_up(tb // 2, BATCH_TILE_MIN))
    while tp > 128 and _vmem_estimate(tb, tp, vlp) > budget:
        nk += 1
        tp = _round_up(_cdiv(p, nk), 128)
    return tb, tp, nk


def spectral_discriminator_2d(x, w, b, onehot, counts):
    """x: (B, C, H, W) f32; w: (VL, 1) f32; b: (1, 1) f32;
    onehot: (P, VL) np one-hot; counts: (VL,) np.  Returns (B, 1) f32."""
    B, C, H, W = x.shape
    if C == 3:
        gray = 0.299 * x[:, 0] + 0.587 * x[:, 1] + 0.114 * x[:, 2]
    else:
        gray = x[:, 0]
    # TODO(synk): 2-D real FFT has no Pallas/Mosaic primitive; jnp.fft.rfft2
    # runs as a regular XLA op (a fused DFT-as-two-matmuls would remove this
    # HBM round trip entirely for small images).
    fft = jnp.fft.rfft2(gray)                          # (B, H, W//2+1) complex64
    P = H * (W // 2 + 1)
    power = jnp.real(fft) ** 2 + jnp.imag(fft) ** 2
    # Log power spectrum; sqrt folded into the log (10*log(m^2) == 20*log(m));
    # eps^2 keeps zero bins finite.  Cast to bf16 here: the kernel fed the MXU
    # bf16 anyway, and this cuts its HBM input bytes 4x vs. f32 re+im streams.
    spec = (10.0 * jnp.log(power + EPS * EPS)).astype(jnp.bfloat16)
    spec = spec.reshape(B, P)

    onehot = np.asarray(onehot, np.float32)
    counts = np.asarray(counts, np.float32)
    VL = onehot.shape[1]
    VLp = _round_up(VL, 128)

    # Generation-aware VMEM budget (v5e/v6e ~128 MiB, v7x ~64 MiB) w/ headroom.
    try:
        vmem_cap = int(pltpu.get_tpu_info().vmem_capacity_bytes)
    except Exception:
        vmem_cap = 64 * 1024 * 1024
    budget = max(vmem_cap - (8 << 20), 16 << 20)

    TB, TP, NK = _choose_tiles(B, P, VLp, budget)
    Pp = TP * NK
    Bp = _round_up(B, TB)

    spec_p = jnp.pad(spec, ((0, Bp - B), (0, Pp - P)))
    mask_b16 = jnp.asarray(np.pad(onehot, ((0, Pp - P), (0, VLp - VL))),
                           dtype=jnp.bfloat16)                      # exact 0/1
    inv_cnt = jnp.asarray(
        np.pad(1.0 / counts, (0, VLp - VL), constant_values=1.0),
        dtype=jnp.float32).reshape(1, VLp)
    w_p = jnp.zeros((VLp, N_PAD), jnp.float32).at[:VL, 0:1].set(
        jnp.asarray(w, jnp.float32).reshape(VL, 1))

    vmem_limit = int(min(max(_vmem_estimate(TB, TP, VLp) + (8 << 20), 32 << 20),
                         budget))

    out = pl.pallas_call(
        functools.partial(_spectral_kernel, vl=VL),
        out_shape=jax.ShapeDtypeStruct((Bp, N_PAD), jnp.float32),
        grid=(Bp // TB, NK),
        in_specs=[
            pl.BlockSpec((TB, TP), lambda i, k: (i, k)),      # bf16 spectrum
            pl.BlockSpec((TP, VLp), lambda i, k: (k, 0)),     # one-hot bins
            pl.BlockSpec((1, VLp), lambda i, k: (0, 0)),      # 1/count row
            pl.BlockSpec((VLp, N_PAD), lambda i, k: (0, 0)),  # linear weight
        ],
        out_specs=pl.BlockSpec((TB, N_PAD), lambda i, k: (i, 0)),
        scratch_shapes=[pltpu.VMEM((TB, VLp), jnp.float32)],
        compiler_params=pltpu.CompilerParams(
            dimension_semantics=("parallel", "arbitrary"),
            vmem_limit_bytes=vmem_limit),
    )(spec_p, mask_b16, inv_cnt, w_p)

    bias = jnp.asarray(b, jnp.float32).reshape(())
    return out[:B, :1] + bias


if __name__ == "__main__":
    img_size = 16          # small test size (module default is 64)
    B, C = 2, 3
    key = jax.random.PRNGKey(0)
    kx, kw, kb = jax.random.split(key, 3)
    x = jax.random.uniform(kx, (B, C, img_size, img_size), jnp.float32,
                           minval=-1.0, maxval=1.0)

    onehot, counts, VL = _radial_bins(img_size, img_size)

    # nn.Linear(vector_length, 1) default init: U(-1/sqrt(fan_in), 1/sqrt(fan_in)).
    bound = 1.0 / np.sqrt(VL)
    w = jax.random.uniform(kw, (VL, 1), jnp.float32, minval=-bound, maxval=bound)
    b = jax.random.uniform(kb, (1, 1), jnp.float32, minval=-bound, maxval=bound)

    y = spectral_discriminator_2d(x, w, b, onehot, counts)
    y = jax.block_until_ready(y)
    assert y.shape == (B, 1), y.shape

    # Pure-JAX reference with the same math (bf16 log power spectrum, exact
    # one-hot binning with f32 accumulation, eps-guarded min/max normalization,
    # linear + bias).
    gray = 0.299 * x[:, 0] + 0.587 * x[:, 1] + 0.114 * x[:, 2]
    fft = jnp.fft.rfft2(gray)
    power = jnp.real(fft) ** 2 + jnp.imag(fft) ** 2
    spec_r = (10.0 * jnp.log(power + EPS * EPS)).astype(jnp.bfloat16)
    spec_r = spec_r.reshape(B, -1)
    prof = jnp.dot(spec_r, jnp.asarray(onehot, jnp.bfloat16),
                   preferred_element_type=jnp.float32)
    prof = prof / jnp.asarray(counts, jnp.float32)[None, :]
    prof = prof - prof.min(axis=1, keepdims=True)
    prof = prof / (prof.max(axis=1, keepdims=True) + EPS)
    y_ref = prof @ jnp.asarray(w, jnp.float32) + jnp.asarray(b).reshape(())
    assert jnp.allclose(y, y_ref, rtol=2e-2, atol=2e-2), (y, y_ref)

    print("KERNEL_OK")
</pallas_src>

<mosaic_0001>
module attributes {stable_mosaic.version = 11 : i64} {
  func.func @_spectral_kernel(%arg0: i32, %arg1: i32, %arg2: memref<16x256xbf16, #tpu.memory_space<vmem>>, %arg3: memref<256x128xbf16, #tpu.memory_space<vmem>>, %arg4: memref<1x128xf32, #tpu.memory_space<vmem>>, %arg5: memref<128x128xf32, #tpu.memory_space<vmem>>, %arg6: memref<16x128xf32, #tpu.memory_space<vmem>>, %arg7: memref<16x128xf32, #tpu.memory_space<vmem>>) attributes {dimension_semantics = [#tpu.dimension_semantics<parallel>, #tpu.dimension_semantics<arbitrary>], iteration_bounds = array<i64: 1, 1>, scalar_prefetch = 0 : i64, scratch_operands = 1 : i64, tpu.core_type = #tpu.core_type<tc>, window_params = [{transform_indices = @transform_0, window_bounds = array<i64: 16, 256>}, {transform_indices = @transform_1, window_bounds = array<i64: 256, 128>}, {pipeline_mode = #tpu.pipeline_mode<synchronous>, transform_indices = @transform_2, window_bounds = array<i64: 1, 128>}, {pipeline_mode = #tpu.pipeline_mode<synchronous>, transform_indices = @transform_3, window_bounds = array<i64: 128, 128>}, {transform_indices = @transform_4, window_bounds = array<i64: 16, 128>}]} {
    %c0_i32 = arith.constant 0 : i32
    %0 = arith.cmpi eq, %arg1, %c0_i32 : i32
    %1 = arith.extui %0 : i1 to i32
    %c0_i32_0 = arith.constant 0 : i32
    %2 = arith.cmpi ne, %1, %c0_i32_0 : i32
    scf.if %2 {
      %cst_10 = arith.constant 0.000000e+00 : f32
      %12 = vector.broadcast %cst_10 : f32 to vector<16x128xf32>
      %c0_11 = arith.constant 0 : index
      %c0_12 = arith.constant 0 : index
      %13 = vector.load %arg7[%c0_11, %c0_12] : memref<16x128xf32, #tpu.memory_space<vmem>>, vector<16x128xf32>
      tpu.vector_store %arg7[%c0_11, %c0_12], %12 {strides = array<i32>} : memref<16x128xf32, #tpu.memory_space<vmem>>, vector<16x128xf32>,
    } else {
    }
    %c0 = arith.constant 0 : index
    %c0_1 = arith.constant 0 : index
    %3 = vector.load %arg7[%c0, %c0_1] : memref<16x128xf32, #tpu.memory_space<vmem>>, vector<16x128xf32>
    %c0_2 = arith.constant 0 : index
    %c0_3 = arith.constant 0 : index
    %4 = vector.load %arg2[%c0_2, %c0_3] : memref<16x256xbf16, #tpu.memory_space<vmem>>, vector<16x256xbf16>
    %c0_4 = arith.constant 0 : index
    %c0_5 = arith.constant 0 : index
    %5 = vector.load %arg3[%c0_4, %c0_5] : memref<256x128xbf16, #tpu.memory_space<vmem>>, vector<256x128xbf16>
    %cst = arith.constant dense<0.000000e+00> : vector<16x128xf32>
    %6 = tpu.matmul %4, %5, %cst {dimension_numbers = #tpu.dot_dimension_numbers<[1], [0], [0], [1], [0, 0, 1, 1], [], []>} : vector<16x256xbf16>, vector<256x128xbf16>, vector<16x128xf32> -> vector<16x128xf32>
    %7 = arith.addf %3, %6 : vector<16x128xf32>
    %c0_6 = arith.constant 0 : index
    %c0_7 = arith.constant 0 : index
    %8 = vector.load %arg7[%c0_6, %c0_7] : memref<16x128xf32, #tpu.memory_space<vmem>>, vector<16x128xf32>
    tpu.vector_store %arg7[%c0_6, %c0_7], %7 {strides = array<i32>} : memref<16x128xf32, #tpu.memory_space<vmem>>, vector<16x128xf32>,
    %c0_i32_8 = arith.constant 0 : i32
    %9 = arith.cmpi eq, %arg1, %c0_i32_8 : i32
    %10 = arith.extui %9 : i1 to i32
    %c0_i32_9 = arith.constant 0 : i32
    %11 = arith.cmpi ne, %10, %c0_i32_9 : i32
    scf.if %11 {
      %c0_10 = arith.constant 0 : index
      %c0_11 = arith.constant 0 : index
      %12 = vector.load %arg7[%c0_10, %c0_11] : memref<16x128xf32, #tpu.memory_space<vmem>>, vector<16x128xf32>
      %c0_12 = arith.constant 0 : index
      %c0_13 = arith.constant 0 : index
      %13 = vector.load %arg4[%c0_12, %c0_13] : memref<1x128xf32, #tpu.memory_space<vmem>>, vector<1x128xf32>
      %14 = vector.broadcast %13 : vector<1x128xf32> to vector<16x128xf32>
      %15 = arith.mulf %12, %14 : vector<16x128xf32>
      %16 = tpu.iota {dimensions = array<i32: 1>} : vector<16x128xi32>
      %c12_i32 = arith.constant 12 : i32
      %17 = vector.broadcast %c12_i32 : i32 to vector<16x128xi32>
      %18 = arith.cmpi slt, %16, %17 : vector<16x128xi32>
      %cst_14 = arith.constant 1.000000e+30 : f32
      %19 = vector.broadcast %cst_14 : f32 to vector<16x128xf32>
      %20 = arith.select %18, %15, %19 : vector<16x128xi1>, vector<16x128xf32>
      %cst_15 = arith.constant dense<0x7F800000> : vector<16xf32>
      %21 = vector.multi_reduction <minimumf>, %20, %cst_15 [1] : vector<16x128xf32> to vector<16xf32>
      %22 = vector.shape_cast %21 : vector<16xf32> to vector<16x1xf32>
      %cst_16 = arith.constant -1.000000e+30 : f32
      %23 = vector.broadcast %cst_16 : f32 to vector<16x128xf32>
      %24 = arith.select %18, %15, %23 : vector<16x128xi1>, vector<16x128xf32>
      %cst_17 = arith.constant dense<0xFF800000> : vector<16xf32>
      %25 = vector.multi_reduction <maximumf>, %24, %cst_17 [1] : vector<16x128xf32> to vector<16xf32>
      %26 = vector.shape_cast %25 : vector<16xf32> to vector<16x1xf32>
      %27 = vector.broadcast %22 : vector<16x1xf32> to vector<16x128xf32>
      %28 = arith.subf %15, %27 : vector<16x128xf32>
      %29 = arith.subf %26, %22 : vector<16x1xf32>
      %cst_18 = arith.constant 9.99999993E-9 : f32
      %30 = vector.broadcast %cst_18 : f32 to vector<16x1xf32>
      %31 = arith.addf %29, %30 : vector<16x1xf32>
      %32 = vector.broadcast %31 : vector<16x1xf32> to vector<16x128xf32>
      %33 = arith.divf %28, %32 : vector<16x128xf32>
      %cst_19 = arith.constant 0.000000e+00 : f32
      %34 = vector.broadcast %cst_19 : f32 to vector<16x128xf32>
      %35 = arith.select %18, %33, %34 : vector<16x128xi1>, vector<16x128xf32>
      %c0_20 = arith.constant 0 : index
      %c0_21 = arith.constant 0 : index
      %36 = vector.load %arg5[%c0_20, %c0_21] : memref<128x128xf32, #tpu.memory_space<vmem>>, vector<128x128xf32>
      %cst_22 = arith.constant dense<0.000000e+00> : vector<16x128xf32>
      %37 = tpu.matmul %35, %36, %cst_22 {dimension_numbers = #tpu.dot_dimension_numbers<[1], [0], [0], [1], [0, 0, 1, 1], [], []>} : vector<16x128xf32>, vector<128x128xf32>, vector<16x128xf32> -> vector<16x128xf32>
      %c0_23 = arith.constant 0 : index
      %c0_24 = arith.constant 0 : index
      %38 = vector.load %arg6[%c0_23, %c0_24] : memref<16x128xf32, #tpu.memory_space<vmem>>, vector<16x128xf32>
      tpu.vector_store %arg6[%c0_23, %c0_24], %37 {strides = array<i32>} : memref<16x128xf32, #tpu.memory_space<vmem>>, vector<16x128xf32>,
    } else {
    }
    return
  }
  func.func @transform_0(%arg0: i32, %arg1: i32) -> (i32, i32) {
    %c0_i32 = arith.constant 0 : i32
    return %arg0, %arg1 : i32, i32
  }
  func.func @transform_1(%arg0: i32, %arg1: i32) -> (i32, i32) {
    %c0_i32 = arith.constant 0 : i32
    %c0_i32_0 = arith.constant 0 : i32
    return %arg1, %c0_i32 : i32, i32
  }
  func.func @transform_2(%arg0: i32, %arg1: i32) -> (i32, i32) {
    %c0_i32 = arith.constant 0 : i32
    %c0_i32_0 = arith.constant 0 : i32
    %c0_i32_1 = arith.constant 0 : i32
    return %c0_i32, %c0_i32_0 : i32, i32
  }
  func.func @transform_3(%arg0: i32, %arg1: i32) -> (i32, i32) {
    %c0_i32 = arith.constant 0 : i32
    %c0_i32_0 = arith.constant 0 : i32
    %c0_i32_1 = arith.constant 0 : i32
    return %c0_i32, %c0_i32_0 : i32, i32
  }
  func.func @transform_4(%arg0: i32, %arg1: i32) -> (i32, i32) {
    %c0_i32 = arith.constant 0 : i32
    %c0_i32_0 = arith.constant 0 : i32
    return %arg0, %c0_i32 : i32, i32
  }
}

</mosaic_0001>

<bundles_post_ra>
// kernel: tpu_custom_call.1
= control target key start
LH: loop header
LB: loop body
LE: loop exit
PB: predicated region body
PF: predicated region fallthrough
CT: control target
= control target key end

     0   :  { %9 = vsyncpa [#allocation4], 0  ;;  %s700_s0 = inlined_call_operand.hbm [shape: bf16[16,256], index: 0, kind: input, shape index: {}]   ;;  %s701_s1 = inlined_call_operand.hbm [shape: bf16[256,128], index: 1, kind: input, shape index: {}]   ;;  %s702_s2 = inlined_call_operand.vmem [shape: f32[1,128], index: 2, kind: input, shape index: {}]   ;;  %s703_s3 = inlined_call_operand.hbm [shape: f32[128,128], index: 3, kind: input, shape index: {}]   ;;  %s704_s4 = inlined_call_operand.hbm [shape: f32[16,128], index: 4, kind: output, shape index: {}]  }
   0x1   :  { %10 = vsyncpa [#allocation7], 0 }
   0x2   :  { %11 = vsyncpa [#allocation5], 0  ;;  %s618_s15 = smov [#allocation6]  }
   0x3   :  { %s29_s16 = sshll.u32 %s618_s15, 4  ;;  %s30_s16 = int_to_ptr.vmem [resolvable:$true] %s29_s16 }
   0x4   :  { %s540_s17 = scalar_lea.vmem %s30_s16, 2048  ;;  %p545_p1 = scmp.lt.s32.totalorder %s30_s16, %s30_s16 }
   0x5   :  { %p541_p0 = scmp.ne.s32.totalorder %s30_s16, %s540_s17  ;;  %p546_p2 = scmp.lt.s32.totalorder %s540_s17, %s540_s17 }
   0x7   :  { %p547_p3 = por %p546_p2, %p545_p1 }
   0x9   :  { %p548_p4 = pnand %p547_p3, %p541_p0 }
   0xb   :  { %551 = shalt.err (!%p548_p4)
}
   0xc   :  { %s619_s18 = smov 64   ;;  %s620_s19 = smov 4  }
   0xd   :  { %35 = dma.hbm_to_vmem [thread:$0]  %s701_s1, 2048, %s30_s16, [#allocation7], %s619_s18, %s619_s18, %s620_s19  }
   0xe   :  { %s621_s22 = smov [#allocation3]  }
   0xf   :  { %s17_s23 = sshll.u32 %s621_s22, 4  ;;  %s18_s23 = int_to_ptr.vmem [resolvable:$true] %s17_s23 }
  0x10   :  { %s560_s24 = scalar_lea.vmem %s18_s23, 256  ;;  %p565_p6 = scmp.lt.s32.totalorder %s18_s23, %s18_s23 }
  0x11   :  { %p561_p5 = scmp.ne.s32.totalorder %s18_s23, %s560_s24  ;;  %p566_p7 = scmp.lt.s32.totalorder %s560_s24, %s560_s24 }
  0x13   :  { %p567_p8 = por %p566_p7, %p565_p6 }
  0x15   :  { %p568_p9 = pnand %p567_p8, %p561_p5 }
  0x17   :  { %571 = shalt.err (!%p568_p9)
}
  0x18   :  { %s622_s25 = smov 128   ;;  %s623_s26 = smov 8  }
  0x19   :  { %23 = dma.hbm_to_vmem [thread:$0]  %s700_s0, 256, %s18_s23, [#allocation4], %s622_s25, %s622_s25, %s623_s26  }
  0x1a   :  { %s624_s1 = smov [#allocation8]  }
  0x1b   :  { %s43_s29 = sshll.u32 %s624_s1, 4  ;;  %s44_s29 = int_to_ptr.vmem [resolvable:$true] %s43_s29 }
  0x1c   :  { %s580_s30 = scalar_lea.vmem %s44_s29, 2048  ;;  %p585_p11 = scmp.lt.s32.totalorder %s44_s29, %s44_s29 }
  0x1d   :  { %p581_p10 = scmp.ne.s32.totalorder %s44_s29, %s580_s30  ;;  %p586_p12 = scmp.lt.s32.totalorder %s580_s30, %s580_s30 }
  0x1f   :  { %p587_p13 = por %p586_p12, %p585_p11 }
  0x21   :  { %p588_p0 = pnand %p587_p13, %p581_p10 }
  0x23   :  { %591 = shalt.err (!%p588_p0)
}
  0x24   :  { %49 = dma.hbm_to_vmem [thread:$0]  %s703_s3, 2048, %s44_s29, [#allocation7], %s622_s25, %s622_s25, %s623_s26  }
  0x25   :  { %612 = dma.done.wait [#allocation4], 256  }
  0x26   :  { %613 = vsyncadd [#allocation4], 4294967040 }
  0x27   :  { %614 = dma.done.wait [#allocation7], 4096  }
  0x28   :  { %615 = vsyncadd [#allocation7], 4294963200  ;;  %v509_v0 = vld [vmem:[#allocation6 + $0x78] sm:$0xff]   ;;  %v511_v2 = vld [vmem:[#allocation6 + $0x70] sm:$0xff]   ;;  %v267_v20 = vlaneseq }
  0x29   :  { %v510_v1 = vld [vmem:[#allocation6 + $0x38] sm:$0xff]   ;;  %426 = vmatprep.subr.bf16.mxu0 %v509_v0  ;;  %v512_v3 = vld [vmem:[#allocation6 + $0x30] sm:$0xff]   ;;  %v513_v4 = vld [vmem:[#allocation6 + $0x68] sm:$0xff]  }
  0x2a   :  { %427 = vmatpush3.bf16.msra.mxu0 %v510_v1  ;;  %v514_v5 = vld [vmem:[#allocation6 + $0x28] sm:$0xff]   ;;  %v515_v6 = vld [vmem:[#allocation6 + $0x60] sm:$0xff]   ;;  %v517_v8 = vld [vmem:[#allocation6 + $0x58] sm:$0xff]   ;;  %v666_v22 = vand.u32 127, %v267_v20 }
  0x2b   :  { %428 = vmatprep.subr.bf16.mxu0 %v511_v2  ;;  %v516_v7 = vld [vmem:[#allocation6 + $0x20] sm:$0xff]   ;;  %v518_v9 = vld [vmem:[#allocation6 + $0x18] sm:$0xff]   ;;  %v519_v10 = vld [vmem:[#allocation6 + $0x50] sm:$0xff]  }
  0x2c   :  { %v527_v11 = vld [vmem:[#allocation3 + $0x4] ss:$8 sps:$4 sm:$0xff]   ;;  %v521_v13 = vld [vmem:[#allocation6 + $0x48] sm:$0xff]   ;;  %v523_v15 = vld [vmem:[#allocation6 + $0x40] sm:$0xff]   ;;  %vm269_vm0 = vcmp.lt.s32.totalorder %v666_v22, 12 }
  0x2d   :  { %v520_v12 = vld [vmem:[#allocation6 + $0x10] sm:$0xff]   ;;  %240 = vmatprep.mubr.bf16.mxu0 %v527_v11  ;;  %v522_v14 = vld [vmem:[#allocation6 + $0x8] sm:$0xff]   ;;  %v524_v16 = vld [vmem:[#allocation6] sm:$0xff]  }
  0x2e   :  { %429 = vmatpush3.bf16.msra.mxu0 %v512_v3  ;;  %v525_v17 = vld [vmem:[#allocation3] ss:$8 sps:$4 sm:$0xff]   ;;  %v307_v35 = vld [vmem:[#allocation8 + $0x68] sm:$0xff]  ;;  %v306_v36 = vld [vmem:[#allocation8 + $0x60] sm:$0xff] }
  0x2f   :  { %430 = vmatprep.subr.bf16.mxu0 %v513_v4  ;;  %v309_v18 = vld [vmem:[#allocation8 + $0x78] sm:$0xff]  ;;  %v308_v19 = vld [vmem:[#allocation8 + $0x70] sm:$0xff]  ;;  %v303_v39 = vld [vmem:[#allocation8 + $0x48] sm:$0xff] }
  0x30   :  { %466 = vmatprep.subr.mxu1 %v309_v18  ;;  %v423_v24 = vld [vmem:[%s702_s2] ss:$0 sm:$0xff]  ;;  %v305_v37 = vld [vmem:[#allocation8 + $0x58] sm:$0xff]  ;;  %v302_v40 = vld [vmem:[#allocation8 + $0x40] sm:$0xff]  ;;  %s625_s2 = smov [#allocation9]  }
  0x31   :  { %467 = vmatpush3.msra.mxu1 %v309_v18  ;;  %v304_v38 = vld [vmem:[#allocation8 + $0x50] sm:$0xff]  ;;  %v301_v41 = vld [vmem:[#allocation8 + $0x38] sm:$0xff]  ;;  %v299_v43 = vld [vmem:[#allocation8 + $0x28] sm:$0xff]  ;;  %s392_s7 = sshll.u32 %s625_s2, 4  ;;  %s393_s7 = int_to_ptr.vmem [resolvable:$true] %s392_s7 }
  0x32   :  { %431 = vmatpush3.bf16.msra.mxu0 %v514_v5  ;;  %468 = vmatprep.subr.mxu1 %v308_v19  ;;  %v300_v42 = vld [vmem:[#allocation8 + $0x30] sm:$0xff]  ;;  %v298_v44 = vld [vmem:[#allocation8 + $0x20] sm:$0xff]  ;;  %v297_v45 = vld [vmem:[#allocation8 + $0x18] sm:$0xff]  ;;  %s592_s8 = scalar_lea.vmem %s393_s7, 256  ;;  %p597_p2 = scmp.lt.s32.totalorder %s393_s7, %s393_s7 }
  0x33   :  { %432 = vmatprep.subr.bf16.mxu0 %v515_v6  ;;  %469 = vmatpush3.msra.mxu1 %v308_v19  ;;  %v296_v46 = vld [vmem:[#allocation8 + $0x10] sm:$0xff]  ;;  %v295_v47 = vld [vmem:[#allocation8 + $0x8] sm:$0xff]  ;;  %v294_v48 = vld [vmem:[#allocation8] sm:$0xff]  ;;  %p593_p1 = scmp.ne.s32.totalorder %s393_s7, %s592_s8  ;;  %p598_p3 = scmp.lt.s32.totalorder %s592_s8, %s592_s8 }
  0x34   :  { %470 = vmatprep.subr.mxu1 %v307_v35 }
  0x35   :  { %471 = vmatpush3.msra.mxu1 %v307_v35  ;;  %p599_p4 = por %p598_p3, %p597_p2 }
  0x36   :  { %433 = vmatpush3.bf16.msra.mxu0 %v516_v7  ;;  %472 = vmatprep.subr.mxu1 %v306_v36 }
  0x37   :  { %434 = vmatprep.subr.bf16.mxu0 %v517_v8  ;;  %473 = vmatpush3.msra.mxu1 %v306_v36  ;;  %p600_p5 = pnand %p599_p4, %p593_p1 }
  0x38   :  { %474 = vmatprep.subr.mxu1 %v305_v37 }
  0x39   :  { %475 = vmatpush3.msra.mxu1 %v305_v37 }
  0x3a   :  { %435 = vmatpush3.bf16.msra.mxu0 %v518_v9  ;;  %476 = vmatprep.subr.mxu1 %v304_v38 }
  0x3b   :  { %436 = vmatprep.subr.bf16.mxu0 %v519_v10  ;;  %477 = vmatpush3.msra.mxu1 %v304_v38 }
  0x3c   :  { %478 = vmatprep.subr.mxu1 %v303_v39 }
  0x3d   :  { %479 = vmatpush3.msra.mxu1 %v303_v39 }
  0x3e   :  { %437 = vmatpush3.bf16.msra.mxu0 %v520_v12  ;;  %480 = vmatprep.subr.mxu1 %v302_v40 }
  0x3f   :  { %438 = vmatprep.subr.bf16.mxu0 %v521_v13  ;;  %481 = vmatpush3.msra.mxu1 %v302_v40 }
  0x40   :  { %482 = vmatprep.subr.mxu1 %v301_v41 }
  0x41   :  { %483 = vmatpush3.msra.mxu1 %v301_v41 }
  0x42   :  { %439 = vmatpush3.bf16.msra.mxu0 %v522_v14  ;;  %484 = vmatprep.subr.mxu1 %v300_v42 }
  0x43   :  { %440 = vmatprep.subr.bf16.mxu0 %v523_v15  ;;  %485 = vmatpush3.msra.mxu1 %v300_v42 }
  0x44   :  { %486 = vmatprep.subr.mxu1 %v299_v43 }
  0x45   :  { %487 = vmatpush3.msra.mxu1 %v299_v43 }
  0x46   :  { %441 = vmatpush3.bf16.msra.mxu0 %v524_v16  ;;  %488 = vmatprep.subr.mxu1 %v298_v44 }
  0x47   :  { %489 = vmatpush3.msra.mxu1 %v298_v44 }
  0x48   :  { %490 = vmatprep.subr.mxu1 %v297_v45 }
  0x49   :  { %241 = vmatmul.mubr.bf16.vlgmr.msra.gmra.mxu0 %v525_v17  ;;  %491 = vmatpush3.msra.mxu1 %v297_v45 }
  0x4a   :  { %492 = vmatprep.subr.mxu1 %v296_v46 }
  0x4b   :  { %493 = vmatpush3.msra.mxu1 %v296_v46 }
  0x4c   :  { %494 = vmatprep.subr.mxu1 %v295_v47 }
  0x4d   :  { %495 = vmatpush3.msra.mxu1 %v295_v47 }
  0x4e   :  { %496 = vmatprep.subr.mxu1 %v294_v48 }
  0x4f   :  { %497 = vmatpush3.msra.mxu1 %v294_v48 }
 0x109   :  { %v442_v21 = vpop.f32.mrf.mxu0 }
 0x10b   :  { %v443_v23 = vpop.f32.mrf.mxu0 }
 0x10c   :  { %v444_v25 = vadd.f32 %v443_v23, %v442_v21 }
 0x10d   :  { %v445_v26 = vpop.f32.mrf.mxu0 }
 0x10e   :  { %v672_v27 = vmul.f32 %v444_v25, %v423_v24 }
 0x10f   :  { %v446_v28 = vpop.f32.mrf.mxu0 }
 0x110   :  { %v447_v29 = vadd.f32 %v446_v28, %v445_v26  ;;  %v270_v30 = vsel %vm269_vm0, %v672_v27, 1e+30  ;;  %v276_v33 = vsel %vm269_vm0, %v672_v27, -1e+30 }
 0x111   :  { %272 = vmin.xlane.f32.xlu0 %v270_v30 }
 0x112   :  { %v677_v31 = vmul.f32 %v447_v29, %v423_v24 }
 0x114   :  { %v271_v32 = vsel %vm269_vm0, %v677_v31, 1e+30  ;;  %v277_v34 = vsel %vm269_vm0, %v677_v31, -1e+30 }
 0x115   :  { %274 = vmin.xlane.f32.xlu1 %v271_v32  ;;  %278 = vmax.xlane.f32.xlu0 %v276_v33 }
 0x119   :  { %280 = vmax.xlane.f32.xlu1 %v277_v34 }
 0x19a   :  { %v273_v49 = vpop.xlane.xlu0 %272 }
 0x19b   :  { %v282_v57 = vsub.f32 %v672_v27, %v273_v49 }
 0x19e   :  { %v275_v50 = vpop.xlane.xlu1 %274  ;;  %v279_v51 = vpop.xlane.xlu0 %278 }
 0x19f   :  { %v284_v52 = vsub.f32 %v279_v51, %v273_v49  ;;  %v283_v60 = vsub.f32 %v677_v31, %v275_v50 }
 0x1a1   :  { %v286_v53 = vadd.f32 1e-08, %v284_v52 }
 0x1a2   :  { %v281_v54 = vpop.xlane.xlu1 %280 }
 0x1a3   :  { %528 = vrcp.f32 %v286_v53  ;;  %v285_v55 = vsub.f32 %v281_v54, %v275_v50 }
 0x1a5   :  { %v287_v56 = vadd.f32 1e-08, %v285_v55 }
 0x1a7   :  { %530 = vrcp.f32 %v287_v56 }
 0x1b0   :  { %v529_v58 = vpop.eup %528 }
 0x1b1   :  { %v289_v59 = vmul.f32 %v529_v58, %v282_v57 }
 0x1b3   :  { %498 = vmatprep.mubr.msk.f32.mxu1 %vm269_vm0, %v289_v59 }
 0x1b4   :  { %v531_v61 = vpop.eup %530 }
 0x1b5   :  { %v291_v62 = vmul.f32 %v531_v61, %v283_v60 }
 0x1b7   :  { %499 = vmatmul.mubr.msk.f32.vlgmr.msra.gmra.mxu1 %vm269_vm0, %v291_v62 }
 0x277   :  { %v500_v63 = vpop.f32.mrf.mxu1 }
 0x278   :  { %386 = vst [vmem:[#allocation9 + $0x8] sm:$0xff] %v500_v63 }
 0x279   :  { %v376_v0 = vpop.f32.mrf.mxu1 }
 0x27a   :  { %385 = vst [vmem:[#allocation9] sm:$0xff] %v376_v0 }
 0x27b   :  { %603 = shalt.err (!%p600_p5)
}
 0x27c   :  { %398 = dma.vmem_to_hbm [thread:$0]  %s393_s7, 256, %s704_s4, [#allocation5], %s622_s25, %s622_s25, %s623_s26  }
 0x27d   :  { %616 = dma.done.wait [#allocation5], 256  }
 0x27e   :  { %617 = vsyncadd [#allocation5], 4294967040 }
 0x27f   :  { %402 = vsyncpa [#allocation4], 1 }
 0x280   :  { %403 = vsyncpa [#allocation7], 1 }
 0x281   :  { %404 = vsyncpa [#allocation5], 1 }

</bundles_post_ra>
